<compile_context>
chip_gen: v7x
topology: tpu7x:2x2x1
jax: 0.10.0
libtpu: 0.0.40
codegen_flags: <defaults>
</compile_context>

<pallas_src>
from functools import partial

import jax
import jax.numpy as jnp
from jax.experimental import pallas as pl
from jax.experimental.pallas import tpu as pltpu


def _round_up(a, b):
    return (a + b - 1) // b * b


# --------------------------------------------------------------------------- #
# Pass 1: conv matmul + per-tile BN partial statistics
# --------------------------------------------------------------------------- #
def conv_stats_kernel(x_ref, w_ref, conv_ref, psum_ref, psq_ref):
    # x_ref:    (m_tile, K_pad)   im2col rows for this tile
    # w_ref:    (K_pad, C_pad)    flattened conv weights (resident across grid)
    # conv_ref: (m_tile, C_pad)   raw conv output (f32)
    # psum_ref: (1, 1, C_pad)     per-tile per-channel sum
    # psq_ref:  (1, 1, C_pad)     per-tile per-channel sum of squares
    acc = jnp.dot(x_ref[...], w_ref[...], preferred_element_type=jnp.float32)
    conv_ref[...] = acc
    psum_ref[...] = jnp.sum(acc, axis=0)[None, None, :]
    psq_ref[...] = jnp.sum(acc * acc, axis=0)[None, None, :]


# --------------------------------------------------------------------------- #
# Pass 2: fused affine BN (precomputed scale/bias) + ReLU
# --------------------------------------------------------------------------- #
def bn_relu_kernel(conv_ref, scale_ref, bias_ref, o_ref):
    # conv_ref: (m_tile, C_pad), scale/bias: (1, C_pad), o_ref: (m_tile, C_pad)
    y = conv_ref[...] * scale_ref[...] + bias_ref[...]
    o_ref[...] = jnp.maximum(y, 0.0).astype(o_ref.dtype)


# --------------------------------------------------------------------------- #
# Wrapper
# --------------------------------------------------------------------------- #
def _im2col(x_nchw, KH, KW, stride, padding):
    """NCHW input -> (N*Ho*Wo, KH*KW*Cin) patches (kh-major, kw, then Cin)."""
    N, Cin, H, W = x_nchw.shape
    Ho = (H + 2 * padding - KH) // stride + 1
    Wo = (W + 2 * padding - KW) // stride + 1
    x = jnp.transpose(x_nchw, (0, 2, 3, 1))  # NHWC
    x = jnp.pad(x, ((0, 0), (padding, padding), (padding, padding), (0, 0)))
    cols = []
    for kh in range(KH):
        for kw in range(KW):
            cols.append(
                x[:, kh:kh + (Ho - 1) * stride + 1:stride,
                     kw:kw + (Wo - 1) * stride + 1:stride, :])
    patches = jnp.concatenate(cols, axis=-1)  # (N, Ho, Wo, KH*KW*Cin)
    return patches.reshape(N * Ho * Wo, KH * KW * Cin), Ho, Wo


def basic_conv_bn(x_nchw, w_oihw, gamma, beta, *, stride=1, padding=1,
                  eps=1e-5, m_tile=256):
    """Forward of BasicConvBN. Inputs in PyTorch NCHW / OIHW layout."""
    N, Cin, H, W = x_nchw.shape
    Cout, _, KH, KW = w_oihw.shape

    # ---- im2col + padding to MXU/lane-friendly shapes (wrapper glue) -------
    x_cols, Ho, Wo = _im2col(x_nchw, KH, KW, stride, padding)
    M = N * Ho * Wo
    K = KH * KW * Cin

    m_tile = max(8, _round_up(min(m_tile, _round_up(M, 8)), 8))
    K_pad = _round_up(K, 128)
    C_pad = _round_up(Cout, 128)
    M_pad = _round_up(M, m_tile)
    num_tiles = M_pad // m_tile

    x_cols = jnp.pad(x_cols.astype(jnp.float32),
                     ((0, M_pad - M), (0, K_pad - K)))
    # OIHW -> (KH, KW, Cin, Cout) -> (KH*KW*Cin, Cout); matches im2col order.
    w_flat = jnp.transpose(w_oihw, (2, 3, 1, 0)).reshape(K, Cout)
    w_flat = jnp.pad(w_flat.astype(jnp.float32),
                     ((0, K_pad - K), (0, C_pad - Cout)))
    gamma_p = jnp.pad(gamma.astype(jnp.float32), (0, C_pad - Cout))
    beta_p = jnp.pad(beta.astype(jnp.float32), (0, C_pad - Cout))

    # ---- Pass 1: conv + partial BN stats, pipelined over row tiles ---------
    cost1 = pl.CostEstimate(
        flops=2 * M_pad * K_pad * C_pad,
        transcendentals=0,
        bytes_accessed=(M_pad * K_pad + K_pad * C_pad + M_pad * C_pad) * 4)

    conv_out, psum, psq = pl.pallas_call(
        conv_stats_kernel,
        out_shape=(
            jax.ShapeDtypeStruct((M_pad, C_pad), jnp.float32),
            jax.ShapeDtypeStruct((num_tiles, 1, C_pad), jnp.float32),
            jax.ShapeDtypeStruct((num_tiles, 1, C_pad), jnp.float32),
        ),
        grid=(num_tiles,),
        in_specs=[
            pl.BlockSpec((m_tile, K_pad), lambda i: (i, 0)),
            pl.BlockSpec((K_pad, C_pad), lambda i: (0, 0)),   # resident weights
        ],
        out_specs=(
            pl.BlockSpec((m_tile, C_pad), lambda i: (i, 0)),
            pl.BlockSpec((1, 1, C_pad), lambda i: (i, 0, 0)),
            pl.BlockSpec((1, 1, C_pad), lambda i: (i, 0, 0)),
        ),
        compiler_params=pltpu.CompilerParams(
            dimension_semantics=("parallel",),
            vmem_limit_bytes=32 * 1024 * 1024),
        cost_estimate=cost1,
    )(x_cols, w_flat)

    # ---- Tiny cross-tile reduction + scale/bias precompute (plain JAX) -----
    # Padded rows/channels contribute zero; divide by the TRUE count M.
    cnt = jnp.float32(M)
    ch_sum = jnp.sum(psum, axis=(0, 1))                     # (C_pad,)
    ch_sq = jnp.sum(psq, axis=(0, 1))                       # (C_pad,)
    mean = ch_sum / cnt
    var = jnp.maximum(ch_sq / cnt - mean * mean, 0.0)       # biased batch var
    scale = gamma_p * jax.lax.rsqrt(var + eps)
    bias = beta_p - mean * scale

    # ---- Pass 2: fused BN affine + ReLU, pipelined over row tiles ----------
    y2d = pl.pallas_call(
        bn_relu_kernel,
        out_shape=jax.ShapeDtypeStruct((M_pad, C_pad), x_nchw.dtype),
        grid=(num_tiles,),
        in_specs=[
            pl.BlockSpec((m_tile, C_pad), lambda i: (i, 0)),
            pl.BlockSpec((1, C_pad), lambda i: (0, 0)),       # resident scale
            pl.BlockSpec((1, C_pad), lambda i: (0, 0)),       # resident bias
        ],
        out_specs=pl.BlockSpec((m_tile, C_pad), lambda i: (i, 0)),
        compiler_params=pltpu.CompilerParams(
            dimension_semantics=("parallel",),
            vmem_limit_bytes=32 * 1024 * 1024),
    )(conv_out, scale.reshape(1, C_pad), bias.reshape(1, C_pad))

    # ---- Strip padding and restore NCHW ------------------------------------
    out = y2d[:M, :Cout].reshape(N, Ho, Wo, Cout)
    return jnp.transpose(out, (0, 3, 1, 2))


# --------------------------------------------------------------------------- #
# Pure-JAX reference (conv + train-mode BN + ReLU) for verification
# --------------------------------------------------------------------------- #
def _reference(x_nchw, w_oihw, gamma, beta, *, stride, padding, eps):
    conv = jax.lax.conv_general_dilated(
        x_nchw, w_oihw, (stride, stride),
        ((padding, padding), (padding, padding)),
        dimension_numbers=("NCHW", "OIHW", "NCHW"))
    mean = conv.mean(axis=(0, 2, 3), keepdims=True)
    var = conv.var(axis=(0, 2, 3), keepdims=True)            # biased var
    y = (conv - mean) / jnp.sqrt(var + eps)
    y = y * gamma.reshape(1, -1, 1, 1) + beta.reshape(1, -1, 1, 1)
    return jnp.maximum(y, 0.0)


if __name__ == "__main__":
    # BasicConvBN(in_planes=4, out_planes=8, kernel_size=3, stride=1, padding=1,
    #             relu=True, bn=True, bias=False)
    N, Cin, H, W = 2, 4, 16, 16
    Cout, KH, KW = 8, 3, 3
    stride, padding, eps = 1, 1, 1e-5

    key = jax.random.PRNGKey(0)
    kx, kw, kg, kb = jax.random.split(key, 4)
    x = jax.random.normal(kx, (N, Cin, H, W), jnp.float32)
    w = jax.random.normal(kw, (Cout, Cin, KH, KW), jnp.float32) * 0.1
    gamma = 1.0 + 0.1 * jax.random.normal(kg, (Cout,), jnp.float32)
    beta = 0.1 * jax.random.normal(kb, (Cout,), jnp.float32)

    out = basic_conv_bn(x, w, gamma, beta, stride=stride, padding=padding,
                        eps=eps, m_tile=256)   # M = 512 -> 2 row tiles
    out = jax.block_until_ready(out)

    ref = _reference(x, w, gamma, beta, stride=stride, padding=padding, eps=eps)
    assert out.shape == (N, Cout, H, W), out.shape
    assert jnp.allclose(out, ref, atol=1e-4, rtol=1e-4), (
        float(jnp.max(jnp.abs(out - ref))))

    print("KERNEL_OK")
</pallas_src>

<mosaic_0001>
module attributes {stable_mosaic.version = 11 : i64} {
  func.func @conv_stats_kernel(%arg0: i32, %arg1: memref<256x128xf32, #tpu.memory_space<vmem>>, %arg2: memref<128x128xf32, #tpu.memory_space<vmem>>, %arg3: memref<256x128xf32, #tpu.memory_space<vmem>>, %arg4: memref<1x1x128xf32, #tpu.memory_space<vmem>>, %arg5: memref<1x1x128xf32, #tpu.memory_space<vmem>>) attributes {dimension_semantics = [#tpu.dimension_semantics<parallel>], iteration_bounds = array<i64: 2>, scalar_prefetch = 0 : i64, scratch_operands = 0 : i64, tpu.core_type = #tpu.core_type<tc>, window_params = [{transform_indices = @transform_0, window_bounds = array<i64: 256, 128>}, {pipeline_mode = #tpu.pipeline_mode<synchronous>, transform_indices = @transform_1, window_bounds = array<i64: 128, 128>}, {transform_indices = @transform_2, window_bounds = array<i64: 256, 128>}, {transform_indices = @transform_3, window_bounds = array<i64: 1, 1, 128>}, {transform_indices = @transform_4, window_bounds = array<i64: 1, 1, 128>}]} {
    %c0 = arith.constant 0 : index
    %c0_0 = arith.constant 0 : index
    %0 = vector.load %arg1[%c0, %c0_0] : memref<256x128xf32, #tpu.memory_space<vmem>>, vector<256x128xf32>
    %c0_1 = arith.constant 0 : index
    %c0_2 = arith.constant 0 : index
    %1 = vector.load %arg2[%c0_1, %c0_2] : memref<128x128xf32, #tpu.memory_space<vmem>>, vector<128x128xf32>
    %cst = arith.constant dense<0.000000e+00> : vector<256x128xf32>
    %2 = tpu.matmul %0, %1, %cst {dimension_numbers = #tpu.dot_dimension_numbers<[1], [0], [0], [1], [0, 0, 1, 1], [], []>} : vector<256x128xf32>, vector<128x128xf32>, vector<256x128xf32> -> vector<256x128xf32>
    %c0_3 = arith.constant 0 : index
    %c0_4 = arith.constant 0 : index
    %3 = vector.load %arg3[%c0_3, %c0_4] : memref<256x128xf32, #tpu.memory_space<vmem>>, vector<256x128xf32>
    tpu.vector_store %arg3[%c0_3, %c0_4], %2 {strides = array<i32>} : memref<256x128xf32, #tpu.memory_space<vmem>>, vector<256x128xf32>,
    %cst_5 = arith.constant dense<0.000000e+00> : vector<128xf32>
    %4 = vector.multi_reduction <add>, %2, %cst_5 [0] : vector<256x128xf32> to vector<128xf32>
    %5 = vector.shape_cast %4 : vector<128xf32> to vector<1x1x128xf32>
    %c0_6 = arith.constant 0 : index
    %c0_7 = arith.constant 0 : index
    %c0_8 = arith.constant 0 : index
    %6 = vector.load %arg4[%c0_6, %c0_7, %c0_8] : memref<1x1x128xf32, #tpu.memory_space<vmem>>, vector<1x1x128xf32>
    tpu.vector_store %arg4[%c0_6, %c0_7, %c0_8], %5 {strides = array<i32>} : memref<1x1x128xf32, #tpu.memory_space<vmem>>, vector<1x1x128xf32>,
    %7 = arith.mulf %2, %2 : vector<256x128xf32>
    %cst_9 = arith.constant dense<0.000000e+00> : vector<128xf32>
    %8 = vector.multi_reduction <add>, %7, %cst_9 [0] : vector<256x128xf32> to vector<128xf32>
    %9 = vector.shape_cast %8 : vector<128xf32> to vector<1x1x128xf32>
    %c0_10 = arith.constant 0 : index
    %c0_11 = arith.constant 0 : index
    %c0_12 = arith.constant 0 : index
    %10 = vector.load %arg5[%c0_10, %c0_11, %c0_12] : memref<1x1x128xf32, #tpu.memory_space<vmem>>, vector<1x1x128xf32>
    tpu.vector_store %arg5[%c0_10, %c0_11, %c0_12], %9 {strides = array<i32>} : memref<1x1x128xf32, #tpu.memory_space<vmem>>, vector<1x1x128xf32>,
    return
  }
  func.func @transform_0(%arg0: i32) -> (i32, i32) {
    %c0_i32 = arith.constant 0 : i32
    %c0_i32_0 = arith.constant 0 : i32
    return %arg0, %c0_i32 : i32, i32
  }
  func.func @transform_1(%arg0: i32) -> (i32, i32) {
    %c0_i32 = arith.constant 0 : i32
    %c0_i32_0 = arith.constant 0 : i32
    %c0_i32_1 = arith.constant 0 : i32
    return %c0_i32, %c0_i32_0 : i32, i32
  }
  func.func @transform_2(%arg0: i32) -> (i32, i32) {
    %c0_i32 = arith.constant 0 : i32
    %c0_i32_0 = arith.constant 0 : i32
    return %arg0, %c0_i32 : i32, i32
  }
  func.func @transform_3(%arg0: i32) -> (i32, i32, i32) {
    %c0_i32 = arith.constant 0 : i32
    %c0_i32_0 = arith.constant 0 : i32
    %c0_i32_1 = arith.constant 0 : i32
    return %arg0, %c0_i32, %c0_i32_0 : i32, i32, i32
  }
  func.func @transform_4(%arg0: i32) -> (i32, i32, i32) {
    %c0_i32 = arith.constant 0 : i32
    %c0_i32_0 = arith.constant 0 : i32
    %c0_i32_1 = arith.constant 0 : i32
    return %arg0, %c0_i32, %c0_i32_0 : i32, i32, i32
  }
}

</mosaic_0001>

<bundles_post_ra>
// kernel: tpu_custom_call.1
= control target key start
LH: loop header
LB: loop body
LE: loop exit
PB: predicated region body
PF: predicated region fallthrough
CT: control target
= control target key end

     0   :  { %10 = vsyncpa [#allocation3], 0  ;;  %s1785_s0 = inlined_call_operand.hbm [shape: f32[512,128], index: 0, kind: input, shape index: {}]   ;;  %s1786_s1 = inlined_call_operand.hbm [shape: f32[128,128], index: 1, kind: input, shape index: {}]   ;;  %s1787_s2 = inlined_call_operand.hbm [shape: f32[512,128], index: 2, kind: output, shape index: {0}]   ;;  %s1788_s3 = inlined_call_operand.hbm [shape: f32[2,1,128], index: 3, kind: output, shape index: {1}]   ;;  %s1789_s4 = inlined_call_operand.hbm [shape: f32[2,1,128], index: 4, kind: output, shape index: {2}]  }
   0x1   :  { %12 = vsyncpa [#allocation3 + $0x1], 0 }
   0x2   :  { %13 = vsyncpa [#allocation6], 0 }
   0x3   :  { %14 = vsyncpa [#allocation4], 0 }
   0x4   :  { %16 = vsyncpa [#allocation4 + $0x1], 0 }
   0x5   :  { %17 = vsyncpa [#allocation9], 0 }
   0x6   :  { %19 = vsyncpa [#allocation9 + $0x1], 0  ;;  %s1337_s15 = smov 0   ;;  %s1339_s16 = smov 0  }
   0x7   :  { %s1341_s17 = smov 0   ;;  %s1343_s18 = smov 0  }
   0x8 LB: > { %s1358_s19 = sadd.s32 4294967295, %s1301_s18   ;;  %s846_s20 = sadd.s32 4294967294, %s1301_s18   ;;  %s1301_s18 = sphi %s1343_s18, %s1809_s18   ;;  %s1297_s17 = sphi %s1341_s17, %s1808_s17   ;;  %s1293_s16 = sphi %s1339_s16, %s1807_s16   ;;  %s1289_s15 = sphi %s1337_s15, %s1806_s15  }
   0x9   : > { %p45_p0 = scmp.ne.s32.totalorder %s1293_s16, %s1289_s15  ;;  %p1790_p1 = scmp.eq.s32.totalorder %s1358_s19, 0 }
   0xa   : > { %p96_p3 = scmp.eq.s32.totalorder %s846_s20, 1  ;;  %p847_p5 = scmp.ge.s32.totalorder %s1301_s18, 1 }
   0xb   : > { %p1369_p4 = por %p1790_p1, %p45_p0  ;;  %p155_p7 = scmp.lt.s32.totalorder %s1301_s18, 3 }
   0xc   : > { %p1374_p6 = por %p96_p3, %p45_p0  ;;  %s1303_s24 = smov [#allocation5]  }
   0xd   : > { %s1793_s21 = scalar_select %p1369_p4, 1, 0 }
   0xe   : > { %s1794_s22 = scalar_select %p1374_p6, 1, 0 }
   0xf   : > { %p1379_p8 = pnand %p847_p5, %p155_p7  ;;  %s167_s25 = sshll.u32 %s1303_s24, 4  ;;  %s1383_s25 = int_to_ptr.vmem [resolvable:$true] %s167_s25 }
  0x10   : > { %s1395_s27 = sadd.s32 1, %s1301_s18   ;;  %s32_s28 = sadd.s32 1, %s1297_s17 }
  0x11   : > { %s1795_s23 = scalar_select %p1379_p8, 1, 0 }
  0x12   : > { %p1054_p9 = pneg %p1379_p8  ;;  %s29_s29 = ssub.s32 %s1301_s18, %s1395_s27 }
  0x13   : > { %s1113_s6 = scalar_lea.hbm %s1786_s1, 2048 }
  0x14   : > { %p1390_p11 = pnand %p1054_p9, %p1790_p1  ;;  %p1114_p12 = scmp.ne.s32.totalorder %s1786_s1, %s1113_s6 }
  0x15   : > { %p1120_p5 = scmp.lt.u32.totalorder %s1113_s6, %s1786_s1 }
  0x16   : > { %p1115_p13 = pneg %p1390_p11 }
  0x18   : > { %p1116_p0 = pnand %p1115_p13, %p1114_p12 }
  0x1a   : > { %p1117_p3 = pneg %p1116_p0 }
  0x1c   : > { %p1122_p7 = pnand %p1120_p5, %p1117_p3 }
  0x1e   : > { %1125 = shalt.err (!%p1122_p7)
}
  0x1f   : > { %s1126_s11 = scalar_lea.vmem %s1383_s25, 2048  ;;  %p1134_p2 = scmp.lt.s32.totalorder %s1383_s25, %s1383_s25 }
  0x20   : > { %p1127_p9 = scmp.ne.s32.totalorder %s1383_s25, %s1126_s11  ;;  %p1135_p6 = scmp.lt.s32.totalorder %s1126_s11, %s1126_s11 }
  0x22   : > { %p1129_p10 = pnand %p1127_p9, %p1115_p13  ;;  %p1136_p4 = por %p1135_p6, %p1134_p2 }
  0x24   : > { %p1130_p1 = pneg %p1129_p10 }
  0x26   : > { %p1137_p8 = pnand %p1136_p4, %p1130_p1 }
  0x28   : > { %1140 = shalt.err (!%p1137_p8)
}
  0x29   : > { %s1304_s12 = smov 128   ;;  %s1305_s13 = smov 8  }
  0x2a   : > { %1057 = dma.hbm_to_vmem [thread:$0]  (!%p1390_p11), %s1786_s1, 2048, %s1383_s25, [#allocation6], %s1304_s12, %s1304_s12, %s1305_s13  }
  0x2b   : > { %p30_p1 = scmp.eq.s32.totalorder %s29_s29, 0  ;;  %p39_p2 = scmp.ne.s32.totalorder %s1297_s17, %s1293_s16 }
  0x2c   : > { %p40_p4 = scmp.eq.s32.totalorder %s1301_s18, 0  ;;  %p1073_p6 = scmp.lt.s32.totalorder %s1301_s18, 2 }
  0x2d   : > { %s1429_s30 = scalar_select %p30_p1, %s1297_s17, %s32_s28  }
  0x2e   : > { %p41_p8 = por %p40_p4, %p39_p2  ;;  %p1797_p10 = scmp.eq.s32.totalorder %s1358_s19, 1 }
  0x2f   : > { %s181_s26 = sand.u32 1, %s1297_s17   ;;  %s864_s6 = sshll.u32 %s1301_s18, 12 }
  0x30   : > { %p1433_p12 = por %p1797_p10, %p39_p2  ;;  %s850_s7 = sshll.u32 %s181_s26, 8 }
  0x31   : > { %s1442_s10 = scalar_lea.hbm %s1785_s0, %s864_s6  ;;  %s185_s25 = scalar_lea.vmem [#allocation2], %s850_s7 }
  0x32   : > { %s192_s28 = sshll.u32 %s185_s25, 4  ;;  %p1444_p11 = pnand %p1073_p6, %p41_p8  ;;  %s1448_s28 = int_to_ptr.vmem [resolvable:$true] %s192_s28 }
  0x33   : > { %s1450_s11 = scalar_lea.sflag [#allocation3], %s181_s26  ;;  %s1141_s14 = scalar_lea.hbm %s1442_s10, 4096 }
  0x34   : > { %p1142_p13 = scmp.ne.s32.totalorder %s1442_s10, %s1141_s14  ;;  %p1143_p0 = pneg %p1444_p11 }
  0x35   : > { %s1146_s7 = scalar_lea.hbm %s1785_s0, 8192  ;;  %p1147_p7 = scmp.lt.u32.totalorder %s1442_s10, %s1785_s0 }
  0x36   : > { %p1144_p3 = pnand %p1143_p0, %p1142_p13  ;;  %p1148_p9 = scmp.lt.u32.totalorder %s1146_s7, %s1141_s14 }
  0x37   : > { %p1150_p2 = scmp.lt.u32.totalorder %s1141_s14, %s1442_s10 }
  0x38   : > { %p1145_p5 = pneg %p1144_p3  ;;  %p1149_p1 = por %p1148_p9, %p1147_p7 }
  0x3a   : > { %p1151_p4 = por %p1150_p2, %p1149_p1 }
  0x3c   : > { %p1152_p6 = pnand %p1151_p4, %p1145_p5 }
  0x3e   : > { %1155 = shalt.err (!%p1152_p6)
}
  0x3f   : > { %s1156_s26 = scalar_lea.vmem %s1448_s28, 4096  ;;  %s1306_s25 = smov [#allocation2]  }
  0x40   : > { %p1157_p8 = scmp.ne.s32.totalorder %s1448_s28, %s1156_s26  ;;  %s1161_s24 = sshll.u32 %s1306_s25, 4  ;;  %s1162_s24 = int_to_ptr.vmem [resolvable:$false] %s1161_s24 }
  0x41   : > { %s1163_s6 = scalar_lea.vmem %s1162_s24, 8192  ;;  %p1164_p3 = scmp.lt.s32.totalorder %s1448_s28, %s1162_s24 }
  0x42   : > { %p1159_p10 = pnand %p1157_p8, %p1143_p0  ;;  %p1165_p7 = scmp.lt.s32.totalorder %s1163_s6, %s1156_s26 }
  0x44   : > { %p1160_p13 = pneg %p1159_p10  ;;  %p1166_p9 = por %p1165_p7, %p1164_p3 }
  0x46   : > { %p1167_p1 = pnand %p1166_p9, %p1160_p13 }
  0x48   : > { %1170 = shalt.err (!%p1167_p1)
}
  0x49   : > { %1061 = dma.hbm_to_vmem [thread:$0]  (!%p1444_p11), %s1442_s10, 4096, %s1448_s28, %s1450_s11, %s1304_s12, %s1304_s12, %s1305_s13  }
  0x4a   : > { %p1800_p0 = scmp.ne.s32.totalorder %s1795_s23, 0 }
  0x4b   : > { %s1484_s14 = sand.u32 (!%p1800_p0), 1, %s1293_s16   ;;  %p1801_p5 = scmp.ne.s32.totalorder (!%p1800_p0), %s1793_s21, 0 }
  0x4c   : > { %204 = sbr.rel (%p1800_p0) target bundleno = 458 (0x1ca), region = 28  ;;  %s854_s7 = sshll.u32 (!%p1800_p0), %s1484_s14, 8 }
  0x4d   : > { %s207_s8 = scalar_lea.sflag (!%p1800_p0), [#allocation3], %s1484_s14  ;;  %s1490_s29 = scalar_lea.vmem (!%p1800_p0), [#allocation2], %s854_s7 }
  0x53   : > { %1272 = dma.done.wait (%p1801_p5), %s207_s8, 4096  }
  0x54   : > { %1274 = vsyncadd (%p1801_p5), %s207_s8, 4294963200  ;;  %p1802_p11 = scmp.eq.s32.totalorder %s1358_s19, 0 }
  0x56   : > { %1276 = dma.done.wait (%p1802_p11), [#allocation6], 2048   ;;  %p1803_p2 = pmov %p1802_p11 }
  0x57   : > { %v281_v0 = vld [vmem:[#allocation5] sm:$0xff]  ;;  %v282_v1 = vld [vmem:[#allocation5 + $0x8] sm:$0xff]  ;;  %v283_v2 = vld [vmem:[#allocation5 + $0x10] sm:$0xff]  ;;  %s1536_s21 = scalar_lea.vmem [#allocation7], %s854_s7  ;;  %s865_s23 = sshll.u32 %s1358_s19, 12 }
  0x58   : > { %1278 = vsyncadd (%p1803_p2), [#allocation6], 4294965248  ;;  %v994_v3 = vpack.c.bf16 %v282_v1, %v281_v0  ;;  %v284_v4 = vld [vmem:[#allocation5 + $0x18] sm:$0xff]  ;;  %v285_v6 = vld [vmem:[#allocation5 + $0x20] sm:$0xff]  ;;  %s684_s12 = sshll.u32 %s1536_s21, 4  ;;  %s1611_s28 = scalar_lea.hbm %s1787_s2, %s865_s23  ;;  %s1613_s12 = int_to_ptr.vmem [resolvable:$true] %s684_s12 }
  0x59   : > { %v998_v5 = vpack.c.bf16 %v284_v4, %v283_v2  ;;  %v286_v7 = vld [vmem:[#allocation5 + $0x28] sm:$0xff]  ;;  %v249_v9 = vld [vmem:[%s1490_s29] sm:$0xff]  ;;  %v287_v10 = vld [vmem:[#allocation5 + $0x30] sm:$0xff]  ;;  %s663_s11 = scalar_lea.sflag [#allocation4], %s1484_s14  ;;  %s1171_s9 = scalar_lea.vmem %s1613_s12, 4096 }
  0x5a   : > { %995 = vmatprep.subr.bf16.mxu0 %v994_v3  ;;  %1026 = vmatprep.subr.bf16.mxu1 %v994_v3  ;;  %v1002_v8 = vpack.c.bf16 %v286_v7, %v285_v6  ;;  %v288_v11 = vld [vmem:[#allocation5 + $0x38] sm:$0xff]  ;;  %v289_v13 = vld [vmem:[#allocation5 + $0x40] sm:$0xff]  ;;  %v290_v14 = vld [vmem:[#allocation5 + $0x48] sm:$0xff]  ;;  %p1172_p4 = scmp.ne.s32.totalorder %s1613_s12, %s1171_s9  ;;  %s1307_s26 = smov [#allocation7]  }
  0x5b   : > { %997 = vmatpush3.bf16.msra.mxu0 %v994_v3  ;;  %1034 = vmatpush3.bf16.msra.mxu1 %v994_v3  ;;  %v1006_v12 = vpack.c.bf16 %v288_v11, %v287_v10  ;;  %v265_v15 = vld [vmem:[%s1490_s29 + $0x80] sm:$0xff]  ;;  %v1010_v16 = vpack.c.bf16 %v290_v14, %v289_v13  ;;  %v291_v17 = vld [vmem:[#allocation5 + $0x50] sm:$0xff]  ;;  %v292_v18 = vld [vmem:[#allocation5 + $0x58] sm:$0xff]  ;;  %s1175_s25 = sshll.u32 %s1307_s26, 4  ;;  %s1176_s25 = int_to_ptr.vmem [resolvable:$false] %s1175_s25 }
  0x5c   : > { %999 = vmatprep.subr.bf16.mxu0 %v998_v5  ;;  %1027 = vmatprep.subr.bf16.mxu1 %v998_v5  ;;  %v1014_v19 = vpack.c.bf16 %v292_v18, %v291_v17  ;;  %v293_v20 = vld [vmem:[#allocation5 + $0x60] sm:$0xff]  ;;  %v294_v21 = vld [vmem:[#allocation5 + $0x68] sm:$0xff]  ;;  %v295_v23 = vld [vmem:[#allocation5 + $0x70] sm:$0xff]  ;;  %p1173_p6 = pnand %p1172_p4, %p1433_p12  ;;  %s1177_s24 = scalar_lea.vmem %s1176_s25, 8192 }
  0x5d   : > { %946 = vmatprep.mubr.f32.mxu0 %v249_v9  ;;  %970 = vmatprep.mubr.f32.mxu1 %v265_v15  ;;  %v1018_v22 = vpack.c.bf16 %v294_v21, %v293_v20  ;;  %v296_v24 = vld [vmem:[#allocation5 + $0x78] sm:$0xff]  ;;  %v250_v26 = vld [vmem:[%s1490_s29 + $0x8] sm:$0xff]  ;;  %v251_v28 = vld [vmem:[%s1490_s29 + $0x10] sm:$0xff]  ;;  %p1178_p10 = scmp.lt.s32.totalorder %s1613_s12, %s1176_s25  ;;  %p1179_p13 = scmp.lt.s32.totalorder %s1177_s24, %s1171_s9 }
  0x5e   : > { %v1022_v25 = vpack.c.bf16 %v296_v24, %v295_v23  ;;  %v266_v27 = vld [vmem:[%s1490_s29 + $0x88] sm:$0xff]  ;;  %v267_v29 = vld [vmem:[%s1490_s29 + $0x90] sm:$0xff]  ;;  %v252_v30 = vld [vmem:[%s1490_s29 + $0x18] sm:$0xff]  ;;  %p1174_p8 = pneg %p1173_p6 }
  0x5f   : > { %1001 = vmatpush3.bf16.msra.mxu0 %v998_v5  ;;  %1035 = vmatpush3.bf16.msra.mxu1 %v998_v5  ;;  %v268_v31 = vld [vmem:[%s1490_s29 + $0x98] sm:$0xff]  ;;  %v253_v32 = vld [vmem:[%s1490_s29 + $0x20] sm:$0xff]  ;;  %v254_v34 = vld [vmem:[%s1490_s29 + $0x28] sm:$0xff]  ;;  %p1180_p3 = por %p1179_p13, %p1178_p10 }
  0x60   : > { %1003 = vmatprep.subr.bf16.mxu0 %v1002_v8  ;;  %1028 = vmatprep.subr.bf16.mxu1 %v1002_v8  ;;  %v269_v33 = vld [vmem:[%s1490_s29 + $0xa0] sm:$0xff]  ;;  %v270_v35 = vld [vmem:[%s1490_s29 + $0xa8] sm:$0xff]  ;;  %v255_v36 = vld [vmem:[%s1490_s29 + $0x30] sm:$0xff] }
  0x61   : > { %v271_v37 = vld [vmem:[%s1490_s29 + $0xb0] sm:$0xff]  ;;  %v256_v38 = vld [vmem:[%s1490_s29 + $0x38] sm:$0xff]  ;;  %v257_v40 = vld [vmem:[%s1490_s29 + $0x40] sm:$0xff]  ;;  %p1181_p7 = pnand %p1180_p3, %p1174_p8 }
  0x62   : > { %v272_v39 = vld [vmem:[%s1490_s29 + $0xb8] sm:$0xff]  ;;  %v273_v41 = vld [vmem:[%s1490_s29 + $0xc0] sm:$0xff]  ;;  %v258_v42 = vld [vmem:[%s1490_s29 + $0x48] sm:$0xff] }
  0x63   : > { %1005 = vmatpush3.bf16.msra.mxu0 %v1002_v8  ;;  %1036 = vmatpush3.bf16.msra.mxu1 %v1002_v8  ;;  %v274_v43 = vld [vmem:[%s1490_s29 + $0xc8] sm:$0xff]  ;;  %v259_v44 = vld [vmem:[%s1490_s29 + $0x50] sm:$0xff]  ;;  %v260_v46 = vld [vmem:[%s1490_s29 + $0x58] sm:$0xff] }
  0x64   : > { %1007 = vmatprep.subr.bf16.mxu0 %v1006_v12  ;;  %1029 = vmatprep.subr.bf16.mxu1 %v1006_v12  ;;  %v275_v45 = vld [vmem:[%s1490_s29 + $0xd0] sm:$0xff]  ;;  %v276_v47 = vld [vmem:[%s1490_s29 + $0xd8] sm:$0xff]  ;;  %v261_v48 = vld [vmem:[%s1490_s29 + $0x60] sm:$0xff] }
  0x65   : > { %v277_v49 = vld [vmem:[%s1490_s29 + $0xe0] sm:$0xff]  ;;  %v262_v50 = vld [vmem:[%s1490_s29 + $0x68] sm:$0xff]  ;;  %v263_v52 = vld [vmem:[%s1490_s29 + $0x70] sm:$0xff] }
  0x66   : > { %v278_v51 = vld [vmem:[%s1490_s29 + $0xe8] sm:$0xff]  ;;  %v279_v53 = vld [vmem:[%s1490_s29 + $0xf0] sm:$0xff]  ;;  %v264_v54 = vld [vmem:[%s1490_s29 + $0x78] sm:$0xff] }
  0x67   : > { %1009 = vmatpush3.bf16.msra.mxu0 %v1006_v12  ;;  %1037 = vmatpush3.bf16.msra.mxu1 %v1006_v12  ;;  %v280_v55 = vld [vmem:[%s1490_s29 + $0xf8] sm:$0xff] }
  0x68   : > { %1011 = vmatprep.subr.bf16.mxu0 %v1010_v16  ;;  %1030 = vmatprep.subr.bf16.mxu1 %v1010_v16 }
  0x6b   : > { %1013 = vmatpush3.bf16.msra.mxu0 %v1010_v16  ;;  %1038 = vmatpush3.bf16.msra.mxu1 %v1010_v16 }
  0x6c   : > { %1015 = vmatprep.subr.bf16.mxu0 %v1014_v19  ;;  %1031 = vmatprep.subr.bf16.mxu1 %v1014_v19 }
  0x6f   : > { %1017 = vmatpush3.bf16.msra.mxu0 %v1014_v19  ;;  %1039 = vmatpush3.bf16.msra.mxu1 %v1014_v19 }
  0x70   : > { %1019 = vmatprep.subr.bf16.mxu0 %v1018_v22  ;;  %1032 = vmatprep.subr.bf16.mxu1 %v1018_v22 }
  0x73   : > { %1021 = vmatpush3.bf16.msra.mxu0 %v1018_v22  ;;  %1040 = vmatpush3.bf16.msra.mxu1 %v1018_v22 }
  0x74   : > { %1023 = vmatprep.subr.bf16.mxu0 %v1022_v25  ;;  %1033 = vmatprep.subr.bf16.mxu1 %v1022_v25 }
  0x77   : > { %1025 = vmatpush3.bf16.msra.mxu0 %v1022_v25  ;;  %1041 = vmatpush3.bf16.msra.mxu1 %v1022_v25 }
  0x7a   : > { %947 = vmatmul.mubr.f32.vlgmr.msra.gmra.mrb[0].mxu0 %v250_v26  ;;  %971 = vmatmul.mubr.f32.vlgmr.msra.gmra.mrb[0].mxu1 %v266_v27 }
  0x7b   : > { %949 = vmatprep.mubr.f32.mxu0 %v251_v28  ;;  %973 = vmatprep.mubr.f32.mxu1 %v267_v29 }
  0x7e   : > { %950 = vmatmul.mubr.f32.gmra.mrb[2].mxu0 %v252_v30  ;;  %974 = vmatmul.mubr.f32.gmra.mrb[2].mxu1 %v268_v31 }
  0x7f   : > { %952 = vmatprep.mubr.f32.mxu0 %v253_v32  ;;  %976 = vmatprep.mubr.f32.mxu1 %v269_v33 }
  0x82   : > { %953 = vmatmul.mubr.f32.gmra.mrb[4].mxu0 %v254_v34  ;;  %977 = vmatmul.mubr.f32.gmra.mrb[4].mxu1 %v270_v35 }
  0x83   : > { %955 = vmatprep.mubr.f32.mxu0 %v255_v36  ;;  %979 = vmatprep.mubr.f32.mxu1 %v271_v37 }
  0x86   : > { %956 = vmatmul.mubr.f32.gmra.mrb[6].mxu0 %v256_v38  ;;  %980 = vmatmul.mubr.f32.gmra.mrb[6].mxu1 %v272_v39 }
  0x87   : > { %958 = vmatprep.mubr.f32.mxu0 %v257_v40  ;;  %982 = vmatprep.mubr.f32.mxu1 %v273_v41 }
  0x8a   : > { %959 = vmatmul.mubr.f32.gmra.mrb[8].mxu0 %v258_v42  ;;  %983 = vmatmul.mubr.f32.gmra.mrb[8].mxu1 %v274_v43 }
  0x8b   : > { %961 = vmatprep.mubr.f32.mxu0 %v259_v44  ;;  %985 = vmatprep.mubr.f32.mxu1 %v275_v45 }
  0x8e   : > { %962 = vmatmul.mubr.f32.gmra.mrb[10].mxu0 %v260_v46  ;;  %986 = vmatmul.mubr.f32.gmra.mrb[10].mxu1 %v276_v47 }
  0x8f   : > { %964 = vmatprep.mubr.f32.mxu0 %v261_v48  ;;  %988 = vmatprep.mubr.f32.mxu1 %v277_v49 }
  0x92   : > { %965 = vmatmul.mubr.f32.gmra.mrb[12].mxu0 %v262_v50  ;;  %989 = vmatmul.mubr.f32.gmra.mrb[12].mxu1 %v278_v51 }
  0x93   : > { %967 = vmatprep.mubr.f32.mxu0 %v263_v52  ;;  %991 = vmatprep.mubr.f32.mxu1 %v279_v53 }
  0x96   : > { %968 = vmatmul.mubr.f32.gmra.mrb[14].mxu0 %v264_v54  ;;  %992 = vmatmul.mubr.f32.gmra.mrb[14].mxu1 %v280_v55 }
 0x14d   : > { %v948_v56 = vpop.f32.mrb[0].mxu0  ;;  %v1532_v57 = vpop.f32.mrb[0].mxu1 }
 0x14e   : > { %523 = vst [vmem:[%s1536_s21 + $0x8] sm:$0xff] %v948_v56  ;;  %v593_v58 = vmul.f32 %v948_v56, %v948_v56  ;;  %v363_v59 = vpop.f32.mrb[1].mxu0  ;;  %539 = vst [vmem:[%s1536_s21 + $0x88] sm:$0xff] %v1532_v57  ;;  %v1541_v60 = vpop.f32.mrb[1].mxu1 }
 0x14f   : > { %522 = vst [vmem:[%s1536_s21] sm:$0xff] %v363_v59  ;;  %v554_v61 = vadd.f32 %v948_v56, %v363_v59  ;;  %v592_v62 = vmul.f32 %v363_v59, %v363_v59  ;;  %538 = vst [vmem:[%s1536_s21 + $0x80] sm:$0xff] %v1541_v60 }
 0x151   : > { %v624_v63 = vadd.f32 %v593_v58, %v592_v62  ;;  %v951_v0 = vpop.f32.mrb[2].mxu0  ;;  %v1546_v1 = vpop.f32.mrb[2].mxu1 }
 0x152   : > { %525 = vst [vmem:[%s1536_s21 + $0x18] sm:$0xff] %v951_v0  ;;  %v373_v2 = vpop.f32.mrb[3].mxu0  ;;  %541 = vst [vmem:[%s1536_s21 + $0x98] sm:$0xff] %v1546_v1  ;;  %v1551_v3 = vpop.f32.mrb[3].mxu1  ;;  %v595_v6 = vmul.f32 %v951_v0, %v951_v0 }
 0x153   : > { %524 = vst [vmem:[%s1536_s21 + $0x10] sm:$0xff] %v373_v2  ;;  %v555_v4 = vadd.f32 %v554_v61, %v373_v2  ;;  %v594_v5 = vmul.f32 %v373_v2, %v373_v2  ;;  %540 = vst [vmem:[%s1536_s21 + $0x90] sm:$0xff] %v1551_v3 }
 0x155   : > { %v625_v7 = vadd.f32 %v624_v63, %v594_v5  ;;  %v954_v8 = vpop.f32.mrb[4].mxu0  ;;  %v556_v9 = vadd.f32 %v951_v0, %v555_v4  ;;  %v1556_v10 = vpop.f32.mrb[4].mxu1 }
 0x156   : > { %527 = vst [vmem:[%s1536_s21 + $0x28] sm:$0xff] %v954_v8  ;;  %v383_v11 = vpop.f32.mrb[5].mxu0  ;;  %543 = vst [vmem:[%s1536_s21 + $0xa8] sm:$0xff] %v1556_v10  ;;  %v1561_v12 = vpop.f32.mrb[5].mxu1  ;;  %v597_v16 = vmul.f32 %v954_v8, %v954_v8 }
 0x157   : > { %526 = vst [vmem:[%s1536_s21 + $0x20] sm:$0xff] %v383_v11  ;;  %v557_v13 = vadd.f32 %v556_v9, %v383_v11  ;;  %v596_v14 = vmul.f32 %v383_v11, %v383_v11  ;;  %v626_v15 = vadd.f32 %v625_v7, %v595_v6  ;;  %542 = vst [vmem:[%s1536_s21 + $0xa0] sm:$0xff] %v1561_v12 }
 0x159   : > { %v627_v17 = vadd.f32 %v626_v15, %v596_v14  ;;  %v957_v18 = vpop.f32.mrb[6].mxu0  ;;  %v558_v19 = vadd.f32 %v954_v8, %v557_v13  ;;  %v1566_v20 = vpop.f32.mrb[6].mxu1 }
 0x15a   : > { %529 = vst [vmem:[%s1536_s21 + $0x38] sm:$0xff] %v957_v18  ;;  %v393_v21 = vpop.f32.mrb[7].mxu0  ;;  %545 = vst [vmem:[%s1536_s21 + $0xb8] sm:$0xff] %v1566_v20  ;;  %v1571_v22 = vpop.f32.mrb[7].mxu1  ;;  %v599_v26 = vmul.f32 %v957_v18, %v957_v18 }
 0x15b   : > { %528 = vst [vmem:[%s1536_s21 + $0x30] sm:$0xff] %v393_v21  ;;  %v559_v23 = vadd.f32 %v558_v19, %v393_v21  ;;  %v598_v24 = vmul.f32 %v393_v21, %v393_v21  ;;  %v628_v25 = vadd.f32 %v627_v17, %v597_v16  ;;  %544 = vst [vmem:[%s1536_s21 + $0xb0] sm:$0xff] %v1571_v22 }
 0x15d   : > { %v629_v27 = vadd.f32 %v628_v25, %v598_v24  ;;  %v960_v28 = vpop.f32.mrb[8].mxu0  ;;  %v560_v29 = vadd.f32 %v957_v18, %v559_v23  ;;  %v1576_v30 = vpop.f32.mrb[8].mxu1 }
 0x15e   : > { %531 = vst [vmem:[%s1536_s21 + $0x48] sm:$0xff] %v960_v28  ;;  %v403_v31 = vpop.f32.mrb[9].mxu0  ;;  %547 = vst [vmem:[%s1536_s21 + $0xc8] sm:$0xff] %v1576_v30  ;;  %v1581_v32 = vpop.f32.mrb[9].mxu1  ;;  %v601_v36 = vmul.f32 %v960_v28, %v960_v28 }
 0x15f   : > { %530 = vst [vmem:[%s1536_s21 + $0x40] sm:$0xff] %v403_v31  ;;  %v561_v33 = vadd.f32 %v560_v29, %v403_v31  ;;  %v600_v34 = vmul.f32 %v403_v31, %v403_v31  ;;  %v630_v35 = vadd.f32 %v629_v27, %v599_v26  ;;  %546 = vst [vmem:[%s1536_s21 + $0xc0] sm:$0xff] %v1581_v32 }
 0x161   : > { %v631_v37 = vadd.f32 %v630_v35, %v600_v34  ;;  %v963_v38 = vpop.f32.mrb[10].mxu0  ;;  %v562_v39 = vadd.f32 %v960_v28, %v561_v33  ;;  %v1586_v40 = vpop.f32.mrb[10].mxu1 }
 0x162   : > { %533 = vst [vmem:[%s1536_s21 + $0x58] sm:$0xff] %v963_v38  ;;  %v413_v41 = vpop.f32.mrb[11].mxu0  ;;  %549 = vst [vmem:[%s1536_s21 + $0xd8] sm:$0xff] %v1586_v40  ;;  %v1591_v42 = vpop.f32.mrb[11].mxu1  ;;  %v603_v46 = vmul.f32 %v963_v38, %v963_v38 }
 0x163   : > { %532 = vst [vmem:[%s1536_s21 + $0x50] sm:$0xff] %v413_v41  ;;  %v563_v43 = vadd.f32 %v562_v39, %v413_v41  ;;  %v602_v44 = vmul.f32 %v413_v41, %v413_v41  ;;  %v632_v45 = vadd.f32 %v631_v37, %v601_v36  ;;  %548 = vst [vmem:[%s1536_s21 + $0xd0] sm:$0xff] %v1591_v42 }
 0x165   : > { %v633_v47 = vadd.f32 %v632_v45, %v602_v44  ;;  %v966_v48 = vpop.f32.mrb[12].mxu0  ;;  %v564_v49 = vadd.f32 %v963_v38, %v563_v43  ;;  %v1596_v50 = vpop.f32.mrb[12].mxu1 }
 0x166   : > { %535 = vst [vmem:[%s1536_s21 + $0x68] sm:$0xff] %v966_v48  ;;  %v423_v51 = vpop.f32.mrb[13].mxu0  ;;  %551 = vst [vmem:[%s1536_s21 + $0xe8] sm:$0xff] %v1596_v50  ;;  %v1603_v52 = vpop.f32.mrb[13].mxu1  ;;  %v605_v56 = vmul.f32 %v966_v48, %v966_v48 }
 0x167   : > { %534 = vst [vmem:[%s1536_s21 + $0x60] sm:$0xff] %v423_v51  ;;  %v565_v53 = vadd.f32 %v564_v49, %v423_v51  ;;  %v604_v54 = vmul.f32 %v423_v51, %v423_v51  ;;  %v634_v55 = vadd.f32 %v633_v47, %v603_v46  ;;  %550 = vst [vmem:[%s1536_s21 + $0xe0] sm:$0xff] %v1603_v52 }
 0x169   : > { %v635_v58 = vadd.f32 %v634_v55, %v604_v54  ;;  %v969_v59 = vpop.f32.mrb[14].mxu0  ;;  %v566_v61 = vadd.f32 %v966_v48, %v565_v53  ;;  %v1615_v62 = vpop.f32.mrb[14].mxu1 }
 0x16a   : > { %537 = vst [vmem:[%s1536_s21 + $0x78] sm:$0xff] %v969_v59  ;;  %v433_v63 = vpop.f32.mrb[15].mxu0  ;;  %553 = vst [vmem:[%s1536_s21 + $0xf8] sm:$0xff] %v1615_v62  ;;  %v1620_v0 = vpop.f32.mrb[15].mxu1 }
 0x16b   : > { %536 = vst [vmem:[%s1536_s21 + $0x70] sm:$0xff] %v433_v63  ;;  %v567_v2 = vadd.f32 %v566_v61, %v433_v63  ;;  %v606_v4 = vmul.f32 %v433_v63, %v433_v63  ;;  %v636_v5 = vadd.f32 %v635_v58, %v605_v56  ;;  %552 = vst [vmem:[%s1536_s21 + $0xf0] sm:$0xff] %v1620_v0 }
 0x16c   : > { %1184 = shalt.err (!%p1181_p7)
}
 0x16d   : > { %s1185_s6 = scalar_lea.hbm %s1611_s28, 4096  ;;  %s1189_s29 = scalar_lea.hbm %s1787_s2, 8192 }
 0x16e   : > { %p1186_p9 = scmp.ne.s32.totalorder %s1611_s28, %s1185_s6  ;;  %p1190_p5 = scmp.lt.u32.totalorder %s1611_s28, %s1787_s2 }
 0x16f   : > { %p1191_p11 = scmp.lt.u32.totalorder %s1189_s29, %s1185_s6  ;;  %p1193_p4 = scmp.lt.u32.totalorder %s1185_s6, %s1611_s28 }
 0x170   : > { %p1187_p1 = pnand %p1186_p9, %p1433_p12 }
 0x171   : > { %p1192_p2 = por %p1191_p11, %p1190_p5 }
 0x172   : > { %p1188_p0 = pneg %p1187_p1 }
 0x173   : > { %p1194_p6 = por %p1193_p4, %p1192_p2 }
 0x175   : > { %p1195_p8 = pnand %p1194_p6, %p1188_p0 }
 0x177   : > { %1198 = shalt.err (!%p1195_p8)
}
 0x178   : > { %s1308_s13 = smov 128   ;;  %s1309_s10 = smov 8   ;;  %v607_v6 = vmul.f32 %v969_v59, %v969_v59  ;;  %v568_v7 = vadd.f32 %v969_v59, %v567_v2  ;;  %v637_v8 = vadd.f32 %v636_v5, %v606_v4  ;;  %v608_v9 = vmul.f32 %v1541_v60, %v1541_v60 }
 0x179   : > { %1048 = dma.vmem_to_hbm [thread:$0]  (%p1433_p12), %s1613_s12, 4096, %s1611_s28, %s663_s11, %s1308_s13, %s1308_s13, %s1309_s10   ;;  %v609_v14 = vmul.f32 %v1532_v57, %v1532_v57  ;;  %v610_v17 = vmul.f32 %v1551_v3, %v1551_v3  ;;  %v611_v21 = vmul.f32 %v1546_v1, %v1546_v1  ;;  %v622_v48 = vmul.f32 %v1620_v0, %v1620_v0 }
 0x17a   : > { %v638_v11 = vadd.f32 %v637_v8, %v607_v6  ;;  %v569_v13 = vadd.f32 %v568_v7, %v1541_v60  ;;  %v612_v60 = vmul.f32 %v1561_v12, %v1561_v12  ;;  %v623_v51 = vmul.f32 %v1615_v62, %v1615_v62  ;;  %s667_s12 = sand.u32 1, %s1358_s19   ;;  %s860_s28 = sshll.u32 %s1358_s19, 4 }
 0x17b   : > { %s240_s11 = scalar_lea.vmem [#allocation8], %s1484_s14  ;;  %s246_s26 = scalar_lea.vmem [#allocation10], %s1484_s14 }
 0x17c   : > { %v639_v15 = vadd.f32 %v638_v11, %v608_v9  ;;  %v570_v16 = vadd.f32 %v1532_v57, %v569_v13  ;;  %v613_v57 = vmul.f32 %v1556_v10, %v1556_v10  ;;  %s700_s9 = sshll.u32 %s240_s11, 4  ;;  %s713_s25 = sshll.u32 %s246_s26, 4  ;;  %s1708_s9 = int_to_ptr.vmem [resolvable:$true] %s700_s9  ;;  %s1715_s25 = int_to_ptr.vmem [resolvable:$true] %s713_s25 }
 0x17d   : > { %s1706_s7 = scalar_lea.hbm %s1788_s3, %s860_s28  ;;  %s1713_s29 = scalar_lea.hbm %s1789_s4, %s860_s28 }
 0x17e   : > { %v571_v18 = vadd.f32 %v570_v16, %v1551_v3  ;;  %v640_v19 = vadd.f32 %v639_v15, %v609_v14  ;;  %v614_v3 = vmul.f32 %v1571_v22, %v1571_v22  ;;  %s1717_s21 = scalar_lea.sflag [#allocation9], %s667_s12  ;;  %s1199_s23 = scalar_lea.vmem %s1708_s9, 16 }
 0x17f   : > { %p1200_p10 = scmp.ne.s32.totalorder %s1708_s9, %s1199_s23  ;;  %s1310_s13 = smov [#allocation8]  }
 0x180   : > { %v641_v23 = vadd.f32 %v640_v19, %v610_v17  ;;  %v572_v24 = vadd.f32 %v1546_v1, %v571_v18  ;;  %v615_v1 = vmul.f32 %v1566_v20, %v1566_v20  ;;  %s1203_s10 = sshll.u32 %s1310_s13, 4  ;;  %s1204_s10 = int_to_ptr.vmem [resolvable:$false] %s1203_s10 }
 0x181   : > { %p1201_p13 = pnand %p1200_p10, %p1433_p12  ;;  %s1205_s24 = scalar_lea.vmem %s1204_s10, 32 }
 0x182   : > { %v573_v25 = vadd.f32 %v572_v24, %v1561_v12  ;;  %v642_v26 = vadd.f32 %v641_v23, %v611_v21  ;;  %v616_v12 = vmul.f32 %v1581_v32, %v1581_v32  ;;  %p1206_p7 = scmp.lt.s32.totalorder %s1708_s9, %s1204_s10  ;;  %p1207_p9 = scmp.lt.s32.totalorder %s1205_s24, %s1199_s23 }
 0x183   : > { %p1202_p3 = pneg %p1201_p13 }
 0x184   : > { %v643_v27 = vadd.f32 %v642_v26, %v612_v60  ;;  %v574_v28 = vadd.f32 %v1556_v10, %v573_v25  ;;  %v617_v10 = vmul.f32 %v1576_v30, %v1576_v30  ;;  %p1208_p1 = por %p1207_p9, %p1206_p7 }
 0x186   : > { %v575_v29 = vadd.f32 %v574_v28, %v1571_v22  ;;  %v644_v31 = vadd.f32 %v643_v27, %v613_v57  ;;  %v618_v22 = vmul.f32 %v1591_v42, %v1591_v42  ;;  %p1209_p0 = pnand %p1208_p1, %p1202_p3 }
 0x188   : > { %v645_v33 = vadd.f32 %v644_v31, %v614_v3  ;;  %v576_v34 = vadd.f32 %v1566_v20, %v575_v29  ;;  %v619_v20 = vmul.f32 %v1586_v40, %v1586_v40 }
 0x18a   : > { %v577_v35 = vadd.f32 %v576_v34, %v1581_v32  ;;  %v646_v36 = vadd.f32 %v645_v33, %v615_v1  ;;  %v620_v32 = vmul.f32 %v1603_v52, %v1603_v52 }
 0x18c   : > { %v647_v37 = vadd.f32 %v646_v36, %v616_v12  ;;  %v578_v38 = vadd.f32 %v1576_v30, %v577_v35  ;;  %v621_v30 = vmul.f32 %v1596_v50, %v1596_v50 }
 0x18e   : > { %v579_v39 = vadd.f32 %v578_v38, %v1591_v42  ;;  %v648_v41 = vadd.f32 %v647_v37, %v617_v10 }
 0x190   : > { %v649_v43 = vadd.f32 %v648_v41, %v618_v22  ;;  %v580_v44 = vadd.f32 %v1586_v40, %v579_v39 }
 0x192   : > { %v581_v45 = vadd.f32 %v580_v44, %v1603_v52  ;;  %v650_v46 = vadd.f32 %v649_v43, %v619_v20 }
 0x194   : > { %v651_v47 = vadd.f32 %v650_v46, %v620_v32  ;;  %v582_v42 = vadd.f32 %v1596_v50, %v581_v45 }
 0x196   : > { %v583_v40 = vadd.f32 %v582_v42, %v1620_v0  ;;  %v652_v49 = vadd.f32 %v651_v47, %v621_v30 }
 0x198   : > { %v584_v52 = vadd.f32 %v1615_v62, %v583_v40  ;;  %v653_v53 = vadd.f32 %v652_v49, %v622_v48 }
 0x19a   : > { %v585_v54 = vrot.slane %v584_v52, 4  ;;  %v654_v55 = vadd.f32 %v653_v53, %v623_v51 }
 0x19c   : > { %v586_v56 = vadd.f32 %v585_v54, %v584_v52  ;;  %v655_v50 = vrot.slane %v654_v55, 4 }
 0x19e   : > { %v587_v58 = vrot.slane %v586_v56, 2  ;;  %v656_v59 = vadd.f32 %v655_v50, %v654_v55 }
 0x1a0   : > { %v588_v61 = vadd.f32 %v587_v58, %v586_v56  ;;  %v657_v63 = vrot.slane %v656_v59, 2 }
 0x1a2   : > { %v589_v0 = vrot.slane %v588_v61, 1  ;;  %v658_v2 = vadd.f32 %v657_v63, %v656_v59 }
 0x1a4   : > { %v590_v62 = vadd.f32 %v589_v0, %v588_v61  ;;  %v659_v4 = vrot.slane %v658_v2, 1 }
 0x1a6   : > { %v660_v5 = vadd.f32 %v659_v4, %v658_v2  ;;  %591 = vst [vmem:[%s240_s11] sm:$0x1] %v590_v62 }
 0x1a7   : > { %1212 = shalt.err (!%p1209_p0)
}
 0x1a8   : > { %s1213_s12 = scalar_lea.hbm %s1706_s7, 16  ;;  %s1217_s6 = scalar_lea.hbm %s1788_s3, 32 }
 0x1a9   : > { %p1214_p5 = scmp.ne.s32.totalorder %s1706_s7, %s1213_s12  ;;  %p1218_p4 = scmp.lt.u32.totalorder %s1706_s7, %s1788_s3 }
 0x1aa   : > { %p1219_p6 = scmp.lt.u32.totalorder %s1217_s6, %s1213_s12  ;;  %p1221_p10 = scmp.lt.u32.totalorder %s1213_s12, %s1706_s7 }
 0x1ab   : > { %p1215_p11 = pnand %p1214_p5, %p1433_p12 }
 0x1ac   : > { %p1220_p8 = por %p1219_p6, %p1218_p4 }
 0x1ad   : > { %p1216_p2 = pneg %p1215_p11 }
 0x1ae   : > { %p1222_p13 = por %p1221_p10, %p1220_p8 }
 0x1b0   : > { %p1223_p3 = pnand %p1222_p13, %p1216_p2 }
 0x1b2   : > { %1226 = shalt.err (!%p1223_p3)
}
 0x1b3   : > { %1049 = dma.vmem_to_hbm [thread:$0]  (%p1433_p12), %s1708_s9, 16, %s1706_s7, %s1717_s21   ;;  %661 = vst [vmem:[%s246_s26] sm:$0x1] %v660_v5 }
 0x1b4   : > { %s1227_s23 = scalar_lea.vmem %s1715_s25, 16  ;;  %s1311_s13 = smov [#allocation10]  }
 0x1b5   : > { %p1228_p7 = scmp.ne.s32.totalorder %s1715_s25, %s1227_s23  ;;  %s1231_s10 = sshll.u32 %s1311_s13, 4  ;;  %s1232_s10 = int_to_ptr.vmem [resolvable:$false] %s1231_s10 }
 0x1b6   : > { %s1233_s24 = scalar_lea.vmem %s1232_s10, 32  ;;  %p1234_p0 = scmp.lt.s32.totalorder %s1715_s25, %s1232_s10 }
 0x1b7   : > { %p1229_p9 = pnand %p1228_p7, %p1433_p12  ;;  %p1235_p5 = scmp.lt.s32.totalorder %s1233_s24, %s1227_s23 }
 0x1b9   : > { %p1230_p1 = pneg %p1229_p9  ;;  %p1236_p11 = por %p1235_p5, %p1234_p0 }
 0x1bb   : > { %p1237_p2 = pnand %p1236_p11, %p1230_p1 }
 0x1bd   : > { %1240 = shalt.err (!%p1237_p2)
}
 0x1be   : > { %s1241_s14 = scalar_lea.hbm %s1713_s29, 16  ;;  %s1245_s7 = scalar_lea.hbm %s1789_s4, 32 }
 0x1bf   : > { %p1242_p4 = scmp.ne.s32.totalorder %s1713_s29, %s1241_s14  ;;  %p1246_p10 = scmp.lt.u32.totalorder %s1713_s29, %s1789_s4 }
 0x1c0   : > { %p1247_p13 = scmp.lt.u32.totalorder %s1245_s7, %s1241_s14  ;;  %p1249_p7 = scmp.lt.u32.totalorder %s1241_s14, %s1713_s29 }
 0x1c1   : > { %p1243_p6 = pnand %p1242_p4, %p1433_p12 }
 0x1c2   : > { %p1248_p3 = por %p1247_p13, %p1246_p10 }
 0x1c3   : > { %p1244_p8 = pneg %p1243_p6 }
 0x1c4   : > { %p1250_p9 = por %p1249_p7, %p1248_p3 }
 0x1c6   : > { %p1251_p1 = pnand %p1250_p9, %p1244_p8 }
 0x1c8   : > { %1254 = shalt.err (!%p1251_p1)
}
 0x1c9   : > { %1050 = dma.vmem_to_hbm [thread:$0]  (%p1433_p12), %s1715_s25, 16, %s1713_s29, %s1717_s21  }
 0x1ca PF: > { %s725_s11 = sand.u32 1, %s1289_s15   ;;  %p1804_p0 = scmp.ne.s32.totalorder %s1794_s22, 0 }
 0x1cb   : > { %p1805_p5 = scmp.ge.s32.totalorder %s1301_s18, 2  ;;  %s726_s6 = scalar_lea.sflag [#allocation4], %s725_s11 }
 0x1cd   : > { %p1063_p11 = pnand %p1805_p5, %p1804_p0 }
 0x1cf   : > { %1280 = dma.done.wait (!%p1063_p11), %s726_s6, 4096  }
 0x1d0   : > { %1282 = vsyncadd (!%p1063_p11), %s726_s6, 4294963200  ;;  %s734_s19 = sand.u32 1, %s846_s20  }
 0x1d1   : > { %s735_s8 = scalar_lea.sflag [#allocation9], %s734_s19 }
 0x1d2   : > { %1284 = dma.done.wait (!%p1063_p11), %s735_s8, 32  }
 0x1d3   : > { %1286 = vsyncadd (!%p1063_p11), %s735_s8, 4294967264  ;;  %p22_p12 = scmp.ge.s32.totalorder %s1395_s27, 4   ;;  %s1806_s15 = smov %s1293_s16 }
 0x1d4   : > { %s1807_s16 = smov %s1297_s17  ;;  %s1808_s17 = smov %s1429_s30 }
 0x1d5   : > { %s1809_s18 = smov %s1395_s27  ;;  %24 = sbr.rel (!%p22_p12) target bundleno = 8 (0x8), region = 109 }
 0x1dc   :  { %747 = vsyncpa [#allocation3], 1 }
 0x1dd   :  { %749 = vsyncpa [#allocation3 + $0x1], 1 }
 0x1de   :  { %750 = vsyncpa [#allocation6], 1 }
 0x1df   :  { %751 = vsyncpa [#allocation4], 1 }
 0x1e0   :  { %753 = vsyncpa [#allocation4 + $0x1], 1 }
 0x1e1   :  { %754 = vsyncpa [#allocation9], 1 }
 0x1e2   :  { %756 = vsyncpa [#allocation9 + $0x1], 1 }

</bundles_post_ra>
